<compile_context>
chip_gen: v5e
topology: v5e:2x2
jax: 0.10.0
libtpu: 0.0.40
codegen_flags: <defaults>
</compile_context>

<pallas_src>
import functools

import jax
import jax.numpy as jnp
from jax import lax
from jax.experimental import pallas as pl
from jax.experimental.pallas import tpu as pltpu

NEG_SLOPE = 0.1


def _leaky(v):
    return jnp.where(v >= 0, v, NEG_SLOPE * v)


def _res_block_kernel(x_ref, w1_ref, b1_ref, w2_ref, b2_ref, mask_ref, o_ref,
                      *, width):
    """One lane chunk (= whole images) of the residual block.

    x_ref    : (Cin, LB)      lanes = flattened (n, y, x); LB % (H*W) == 0
    w1_ref   : (Dp, Cin)      1x1 conv weight, BN1 scale folded, depth padded to Dp
    b1_ref   : (Dp, 1)        f32
    w2_ref   : (9, Cout, Dp)  3x3 taps, k = (dy+1)*3 + (dx+1), BN2 scale folded
    b2_ref   : (Cout, 1)      f32
    mask_ref : (4, LB)        f32 rows: [col!=0, col!=W-1, row!=0, row!=H-1]
    o_ref    : (Cout, LB)
    """
    W = width
    x = x_ref[...].astype(jnp.float32)                 # (Cin, LB)
    LB = x.shape[1]

    # ---- 1x1 conv (BN1 folded) + bias + LeakyReLU; f32 compute (v5e-safe) ----
    h = jnp.dot(w1_ref[...].astype(jnp.float32), x,
                preferred_element_type=jnp.float32)    # (Dp, LB)
    h = _leaky(h + b1_ref[...])

    m_col0 = mask_ref[0:1, :]                          # 0 where x-col == 0
    m_colW = mask_ref[1:2, :]                          # 0 where x-col == W-1
    m_row0 = mask_ref[2:3, :]                          # 0 where y-row == 0
    m_rowH = mask_ref[3:4, :]                          # 0 where y-row == H-1

    # ---- dx-shifted, column-masked variants (XLU rolls; masks kill the wrap) --
    h_m1 = pltpu.roll(h, 1, axis=1) * m_col0           # dx = -1
    h_p1 = pltpu.roll(h, LB - 1, axis=1) * m_colW      # dx = +1
    h_dx = (h_m1, h, h_p1)

    # ---- 3x3 conv as nine accumulating small matmuls (no 9x intermediate) ----
    def row_group(k0, row_shift):
        acc = None
        for j in range(3):                             # dx = -1, 0, +1
            tap = h_dx[j] if row_shift == 0 else pltpu.roll(h_dx[j], row_shift, axis=1)
            part = jnp.dot(w2_ref[k0 + j].astype(jnp.float32), tap,
                           preferred_element_type=jnp.float32)   # (Cout, LB)
            acc = part if acc is None else acc + part
        return acc

    y = row_group(3, 0)                                # dy =  0
    y = y + m_row0 * row_group(0, W)                   # dy = -1 (row mask factored out)
    y = y + m_rowH * row_group(6, LB - W)              # dy = +1

    y = _leaky(y + b2_ref[...])

    # ---- residual add in f32; lane-dense full-width store ----
    o_ref[...] = (x + y).astype(o_ref.dtype)


def _fold_bn(gamma, beta, mean, var, eps=1e-5):
    scale = gamma / jnp.sqrt(var + eps)
    bias = beta - mean * scale
    return scale, bias


def pack_params(w1_oihw, bn1, w2_oihw, bn2, *, eps=1e-5, dtype=jnp.float32):
    """Fold inference-mode BN into the conv weights and pack for the kernel."""
    g1, be1, m1, v1 = bn1
    g2, be2, m2, v2 = bn2
    s1, b1 = _fold_bn(g1, be1, m1, v1, eps)
    s2, b2 = _fold_bn(g2, be2, m2, v2, eps)

    depth, cin = w1_oihw.shape[0], w1_oihw.shape[1]
    cout = w2_oihw.shape[0]
    dp = -(-depth // 8) * 8                            # pad depth to sublane multiple

    w1 = w1_oihw.reshape(depth, cin) * s1[:, None]
    w1 = jnp.zeros((dp, cin), jnp.float32).at[:depth].set(w1)
    b1p = jnp.zeros((dp, 1), jnp.float32).at[:depth, 0].set(b1)

    w2 = w2_oihw * s2[:, None, None, None]             # (Cout, D, 3, 3)
    w2 = jnp.transpose(w2, (2, 3, 0, 1)).reshape(9, cout, depth)   # k = kh*3 + kw
    w2 = jnp.zeros((9, cout, dp), jnp.float32).at[:, :, :depth].set(w2)
    b2p = b2.reshape(cout, 1).astype(jnp.float32)

    return (w1.astype(dtype), b1p, w2.astype(dtype), b2p)


def _make_masks(height, width, images_per_block):
    hw = height * width
    lane = jnp.arange(images_per_block * hw, dtype=jnp.int32)
    col = lane % width
    row = (lane % hw) // width
    return jnp.stack([(col != 0), (col != width - 1),
                      (row != 0), (row != height - 1)]).astype(jnp.float32)


def residual_block(x_nchw, params, *, lane_block_target=2048):
    """x_nchw: (N, C, H, W).  params from pack_params().  Returns (N, C, H, W)."""
    w1, b1, w2, b2 = params
    N, C, H, W = x_nchw.shape
    HW = H * W
    dp = w1.shape[0]
    cout = w2.shape[1]

    # Lane chunk = whole images so 3x3 taps never cross a chunk boundary.
    ipb = 1
    for cand in range(1, N + 1):
        if N % cand:
            continue
        lb = cand * HW
        if lb <= max(lane_block_target, HW) and (lb % 128 == 0 or cand == N):
            ipb = cand
    if (ipb * HW) % 128 != 0 and ipb != N:
        ipb = N                                        # one fat block == full array
    LB = ipb * HW
    grid = (N // ipb,)

    # (N, C, H, W) -> (C, N*H*W): lane-dense layout for every load/store.
    x_cl = jnp.transpose(x_nchw.reshape(N, C, HW), (1, 0, 2)).reshape(C, N * HW)
    masks = _make_masks(H, W, ipb)

    dsize = jnp.dtype(x_cl.dtype).itemsize
    wsize = jnp.dtype(w1.dtype).itemsize
    flops = int(2 * N * HW * (dp * C + 9 * dp * cout))
    bytes_accessed = int(2 * C * N * HW * dsize
                         + (dp * C + 9 * cout * dp) * wsize
                         + (dp + cout) * 4 + 4 * LB * 4)

    # Explicit VMEM budget: double-buffered in/out blocks + params + f32 working set.
    vmem_needed = (2 * 2 * (C + cout) * LB * dsize
                   + 2 * ((dp * C + 9 * cout * dp) * wsize + (dp + cout + 4 * LB) * 4)
                   + 10 * max(dp, cout) * LB * 4)
    vmem_limit = int(min(max(2 * vmem_needed, 16 << 20), 48 << 20))

    out = pl.pallas_call(
        functools.partial(_res_block_kernel, width=W),
        out_shape=jax.ShapeDtypeStruct((cout, N * HW), x_cl.dtype),
        grid_spec=pltpu.PrefetchScalarGridSpec(
            num_scalar_prefetch=0,
            grid=grid,
            in_specs=[
                pl.BlockSpec((C, LB), lambda i: (0, i)),
                pl.BlockSpec((dp, C), lambda i: (0, 0)),
                pl.BlockSpec((dp, 1), lambda i: (0, 0)),
                pl.BlockSpec((9, cout, dp), lambda i: (0, 0, 0)),
                pl.BlockSpec((cout, 1), lambda i: (0, 0)),
                pl.BlockSpec((4, LB), lambda i: (0, 0)),
            ],
            out_specs=pl.BlockSpec((cout, LB), lambda i: (0, i)),
        ),
        compiler_params=pltpu.CompilerParams(
            dimension_semantics=("parallel",),
            vmem_limit_bytes=vmem_limit),
        cost_estimate=pl.CostEstimate(flops=flops, transcendentals=0,
                                      bytes_accessed=bytes_accessed),
    )(x_cl, w1, b1, w2, b2, masks)

    return jnp.transpose(out.reshape(cout, N, HW), (1, 0, 2)).reshape(N, cout, H, W)


def _reference_nchw(x, w1_oihw, bn1, w2_oihw, bn2, eps=1e-5):
    """Pure-JAX reference of the PyTorch forward (inference-mode BN)."""
    s1, b1 = _fold_bn(*bn1, eps=eps)
    s2, b2 = _fold_bn(*bn2, eps=eps)
    dn = ("NCHW", "OIHW", "NCHW")
    h = lax.conv_general_dilated(x, w1_oihw, (1, 1), "VALID", dimension_numbers=dn)
    h = h * s1[None, :, None, None] + b1[None, :, None, None]
    h = jnp.where(h >= 0, h, NEG_SLOPE * h)
    y = lax.conv_general_dilated(h, w2_oihw, (1, 1), ((1, 1), (1, 1)),
                                 dimension_numbers=dn)
    y = y * s2[None, :, None, None] + b2[None, :, None, None]
    y = jnp.where(y >= 0, y, NEG_SLOPE * y)
    return x + y


if __name__ == "__main__":
    key = jax.random.PRNGKey(0)
    N, C, H, W = 2, 8, 16, 16          # inp == oup, stride == 1 -> residual path
    inp = oup = C
    depth = int(oup * 0.5)             # expand_ratio = 0.5 -> 4

    ks = jax.random.split(key, 11)
    x = jax.random.normal(ks[0], (N, C, H, W), jnp.float32)
    w1_oihw = jax.random.normal(ks[1], (depth, inp, 1, 1), jnp.float32) * 0.2
    w2_oihw = jax.random.normal(ks[2], (oup, depth, 3, 3), jnp.float32) * 0.2
    bn1 = (0.5 + jax.random.uniform(ks[3], (depth,), jnp.float32),
           0.1 * jax.random.normal(ks[4], (depth,), jnp.float32),
           0.1 * jax.random.normal(ks[5], (depth,), jnp.float32),
           0.5 + jax.random.uniform(ks[6], (depth,), jnp.float32))
    bn2 = (0.5 + jax.random.uniform(ks[7], (oup,), jnp.float32),
           0.1 * jax.random.normal(ks[8], (oup,), jnp.float32),
           0.1 * jax.random.normal(ks[9], (oup,), jnp.float32),
           0.5 + jax.random.uniform(ks[10], (oup,), jnp.float32))

    ref = _reference_nchw(x, w1_oihw, bn1, w2_oihw, bn2)

    # --- f32 storage path: tight correctness check ---
    params32 = pack_params(w1_oihw, bn1, w2_oihw, bn2, dtype=jnp.float32)
    out32 = residual_block(x, params32)
    jax.block_until_ready(out32)
    assert out32.shape == (N, oup, H, W)
    err32 = float(jnp.max(jnp.abs(out32 - ref)))
    assert jnp.allclose(out32, ref, atol=1e-4, rtol=1e-4), err32

    # --- bf16 storage path (halves HBM traffic; compute stays f32 in-kernel) ---
    params_bf = pack_params(w1_oihw, bn1, w2_oihw, bn2, dtype=jnp.bfloat16)
    out_bf = residual_block(x.astype(jnp.bfloat16), params_bf)
    jax.block_until_ready(out_bf)
    out_bf32 = out_bf.astype(jnp.float32)
    err_bf = float(jnp.max(jnp.abs(out_bf32 - ref)))
    assert jnp.allclose(out_bf32, ref, atol=1e-1, rtol=5e-2), err_bf

    print("KERNEL_OK")
</pallas_src>

<mosaic_0001>
module attributes {stable_mosaic.version = 11 : i64} {
  func.func @_res_block_kernel(%arg0: i32, %arg1: memref<8x512xf32, #tpu.memory_space<vmem>>, %arg2: memref<8x8xf32, #tpu.memory_space<vmem>>, %arg3: memref<8x1xf32, #tpu.memory_space<vmem>>, %arg4: memref<9x8x8xf32, #tpu.memory_space<vmem>>, %arg5: memref<8x1xf32, #tpu.memory_space<vmem>>, %arg6: memref<4x512xf32, #tpu.memory_space<vmem>>, %arg7: memref<8x512xf32, #tpu.memory_space<vmem>>) attributes {dimension_semantics = [#tpu.dimension_semantics<parallel>], iteration_bounds = array<i64: 1>, scalar_prefetch = 0 : i64, scratch_operands = 0 : i64, tpu.core_type = #tpu.core_type<tc>, window_params = [{transform_indices = @transform_0, window_bounds = array<i64: 8, 512>}, {pipeline_mode = #tpu.pipeline_mode<synchronous>, transform_indices = @transform_1, window_bounds = array<i64: 8, 8>}, {pipeline_mode = #tpu.pipeline_mode<synchronous>, transform_indices = @transform_2, window_bounds = array<i64: 8, 1>}, {pipeline_mode = #tpu.pipeline_mode<synchronous>, transform_indices = @transform_3, window_bounds = array<i64: 9, 8, 8>}, {pipeline_mode = #tpu.pipeline_mode<synchronous>, transform_indices = @transform_4, window_bounds = array<i64: 8, 1>}, {pipeline_mode = #tpu.pipeline_mode<synchronous>, transform_indices = @transform_5, window_bounds = array<i64: 4, 512>}, {transform_indices = @transform_6, window_bounds = array<i64: 8, 512>}]} {
    %c0 = arith.constant 0 : index
    %c0_0 = arith.constant 0 : index
    %0 = vector.load %arg1[%c0, %c0_0] : memref<8x512xf32, #tpu.memory_space<vmem>>, vector<8x512xf32>
    %c0_1 = arith.constant 0 : index
    %c0_2 = arith.constant 0 : index
    %1 = vector.load %arg2[%c0_1, %c0_2] : memref<8x8xf32, #tpu.memory_space<vmem>>, vector<8x8xf32>
    %cst = arith.constant dense<0.000000e+00> : vector<8x512xf32>
    %2 = tpu.matmul %1, %0, %cst {dimension_numbers = #tpu.dot_dimension_numbers<[1], [0], [0], [1], [0, 0, 1, 1], [], []>} : vector<8x8xf32>, vector<8x512xf32>, vector<8x512xf32> -> vector<8x512xf32>
    %c0_3 = arith.constant 0 : index
    %c0_4 = arith.constant 0 : index
    %3 = vector.load %arg3[%c0_3, %c0_4] : memref<8x1xf32, #tpu.memory_space<vmem>>, vector<8x1xf32>
    %4 = vector.broadcast %3 : vector<8x1xf32> to vector<8x512xf32>
    %5 = arith.addf %2, %4 : vector<8x512xf32>
    %cst_5 = arith.constant 0.000000e+00 : f32
    %6 = vector.broadcast %cst_5 : f32 to vector<8x512xf32>
    %7 = arith.cmpf oge, %5, %6 : vector<8x512xf32>
    %cst_6 = arith.constant 1.000000e-01 : f32
    %8 = vector.broadcast %cst_6 : f32 to vector<8x512xf32>
    %9 = arith.mulf %8, %5 : vector<8x512xf32>
    %10 = arith.select %7, %5, %9 : vector<8x512xi1>, vector<8x512xf32>
    %c0_7 = arith.constant 0 : index
    %c0_8 = arith.constant 0 : index
    %11 = vector.load %arg6[%c0_7, %c0_8] : memref<4x512xf32, #tpu.memory_space<vmem>>, vector<1x512xf32>
    %c1 = arith.constant 1 : index
    %c0_9 = arith.constant 0 : index
    %12 = vector.load %arg6[%c1, %c0_9] : memref<4x512xf32, #tpu.memory_space<vmem>>, vector<1x512xf32>
    %c2 = arith.constant 2 : index
    %c0_10 = arith.constant 0 : index
    %13 = vector.load %arg6[%c2, %c0_10] : memref<4x512xf32, #tpu.memory_space<vmem>>, vector<1x512xf32>
    %c3 = arith.constant 3 : index
    %c0_11 = arith.constant 0 : index
    %14 = vector.load %arg6[%c3, %c0_11] : memref<4x512xf32, #tpu.memory_space<vmem>>, vector<1x512xf32>
    %c1_i32 = arith.constant 1 : i32
    %15 = tpu.dynamic_rotate %10 by %c1_i32 dim 1 : vector<8x512xf32>, i32 -> vector<8x512xf32>
    %16 = vector.broadcast %11 : vector<1x512xf32> to vector<8x512xf32>
    %17 = arith.mulf %15, %16 : vector<8x512xf32>
    %c511_i32 = arith.constant 511 : i32
    %18 = tpu.dynamic_rotate %10 by %c511_i32 dim 1 : vector<8x512xf32>, i32 -> vector<8x512xf32>
    %19 = vector.broadcast %12 : vector<1x512xf32> to vector<8x512xf32>
    %20 = arith.mulf %18, %19 : vector<8x512xf32>
    %c3_12 = arith.constant 3 : index
    %c0_13 = arith.constant 0 : index
    %c0_14 = arith.constant 0 : index
    %21 = vector.load %arg4[%c3_12, %c0_13, %c0_14] : memref<9x8x8xf32, #tpu.memory_space<vmem>>, vector<1x8x8xf32>
    %22 = vector.shape_cast %21 : vector<1x8x8xf32> to vector<8x8xf32>
    %cst_15 = arith.constant dense<0.000000e+00> : vector<8x512xf32>
    %23 = tpu.matmul %22, %17, %cst_15 {dimension_numbers = #tpu.dot_dimension_numbers<[1], [0], [0], [1], [0, 0, 1, 1], [], []>} : vector<8x8xf32>, vector<8x512xf32>, vector<8x512xf32> -> vector<8x512xf32>
    %c4 = arith.constant 4 : index
    %c0_16 = arith.constant 0 : index
    %c0_17 = arith.constant 0 : index
    %24 = vector.load %arg4[%c4, %c0_16, %c0_17] : memref<9x8x8xf32, #tpu.memory_space<vmem>>, vector<1x8x8xf32>
    %25 = vector.shape_cast %24 : vector<1x8x8xf32> to vector<8x8xf32>
    %cst_18 = arith.constant dense<0.000000e+00> : vector<8x512xf32>
    %26 = tpu.matmul %25, %10, %cst_18 {dimension_numbers = #tpu.dot_dimension_numbers<[1], [0], [0], [1], [0, 0, 1, 1], [], []>} : vector<8x8xf32>, vector<8x512xf32>, vector<8x512xf32> -> vector<8x512xf32>
    %27 = arith.addf %23, %26 : vector<8x512xf32>
    %c5 = arith.constant 5 : index
    %c0_19 = arith.constant 0 : index
    %c0_20 = arith.constant 0 : index
    %28 = vector.load %arg4[%c5, %c0_19, %c0_20] : memref<9x8x8xf32, #tpu.memory_space<vmem>>, vector<1x8x8xf32>
    %29 = vector.shape_cast %28 : vector<1x8x8xf32> to vector<8x8xf32>
    %cst_21 = arith.constant dense<0.000000e+00> : vector<8x512xf32>
    %30 = tpu.matmul %29, %20, %cst_21 {dimension_numbers = #tpu.dot_dimension_numbers<[1], [0], [0], [1], [0, 0, 1, 1], [], []>} : vector<8x8xf32>, vector<8x512xf32>, vector<8x512xf32> -> vector<8x512xf32>
    %31 = arith.addf %27, %30 : vector<8x512xf32>
    %c16_i32 = arith.constant 16 : i32
    %32 = tpu.dynamic_rotate %17 by %c16_i32 dim 1 : vector<8x512xf32>, i32 -> vector<8x512xf32>
    %c0_22 = arith.constant 0 : index
    %c0_23 = arith.constant 0 : index
    %c0_24 = arith.constant 0 : index
    %33 = vector.load %arg4[%c0_22, %c0_23, %c0_24] : memref<9x8x8xf32, #tpu.memory_space<vmem>>, vector<1x8x8xf32>
    %34 = vector.shape_cast %33 : vector<1x8x8xf32> to vector<8x8xf32>
    %cst_25 = arith.constant dense<0.000000e+00> : vector<8x512xf32>
    %35 = tpu.matmul %34, %32, %cst_25 {dimension_numbers = #tpu.dot_dimension_numbers<[1], [0], [0], [1], [0, 0, 1, 1], [], []>} : vector<8x8xf32>, vector<8x512xf32>, vector<8x512xf32> -> vector<8x512xf32>
    %c16_i32_26 = arith.constant 16 : i32
    %36 = tpu.dynamic_rotate %10 by %c16_i32_26 dim 1 : vector<8x512xf32>, i32 -> vector<8x512xf32>
    %c1_27 = arith.constant 1 : index
    %c0_28 = arith.constant 0 : index
    %c0_29 = arith.constant 0 : index
    %37 = vector.load %arg4[%c1_27, %c0_28, %c0_29] : memref<9x8x8xf32, #tpu.memory_space<vmem>>, vector<1x8x8xf32>
    %38 = vector.shape_cast %37 : vector<1x8x8xf32> to vector<8x8xf32>
    %cst_30 = arith.constant dense<0.000000e+00> : vector<8x512xf32>
    %39 = tpu.matmul %38, %36, %cst_30 {dimension_numbers = #tpu.dot_dimension_numbers<[1], [0], [0], [1], [0, 0, 1, 1], [], []>} : vector<8x8xf32>, vector<8x512xf32>, vector<8x512xf32> -> vector<8x512xf32>
    %40 = arith.addf %35, %39 : vector<8x512xf32>
    %c16_i32_31 = arith.constant 16 : i32
    %41 = tpu.dynamic_rotate %20 by %c16_i32_31 dim 1 : vector<8x512xf32>, i32 -> vector<8x512xf32>
    %c2_32 = arith.constant 2 : index
    %c0_33 = arith.constant 0 : index
    %c0_34 = arith.constant 0 : index
    %42 = vector.load %arg4[%c2_32, %c0_33, %c0_34] : memref<9x8x8xf32, #tpu.memory_space<vmem>>, vector<1x8x8xf32>
    %43 = vector.shape_cast %42 : vector<1x8x8xf32> to vector<8x8xf32>
    %cst_35 = arith.constant dense<0.000000e+00> : vector<8x512xf32>
    %44 = tpu.matmul %43, %41, %cst_35 {dimension_numbers = #tpu.dot_dimension_numbers<[1], [0], [0], [1], [0, 0, 1, 1], [], []>} : vector<8x8xf32>, vector<8x512xf32>, vector<8x512xf32> -> vector<8x512xf32>
    %45 = arith.addf %40, %44 : vector<8x512xf32>
    %46 = vector.broadcast %13 : vector<1x512xf32> to vector<8x512xf32>
    %47 = arith.mulf %46, %45 : vector<8x512xf32>
    %48 = arith.addf %31, %47 : vector<8x512xf32>
    %c496_i32 = arith.constant 496 : i32
    %49 = tpu.dynamic_rotate %17 by %c496_i32 dim 1 : vector<8x512xf32>, i32 -> vector<8x512xf32>
    %c6 = arith.constant 6 : index
    %c0_36 = arith.constant 0 : index
    %c0_37 = arith.constant 0 : index
    %50 = vector.load %arg4[%c6, %c0_36, %c0_37] : memref<9x8x8xf32, #tpu.memory_space<vmem>>, vector<1x8x8xf32>
    %51 = vector.shape_cast %50 : vector<1x8x8xf32> to vector<8x8xf32>
    %cst_38 = arith.constant dense<0.000000e+00> : vector<8x512xf32>
    %52 = tpu.matmul %51, %49, %cst_38 {dimension_numbers = #tpu.dot_dimension_numbers<[1], [0], [0], [1], [0, 0, 1, 1], [], []>} : vector<8x8xf32>, vector<8x512xf32>, vector<8x512xf32> -> vector<8x512xf32>
    %c496_i32_39 = arith.constant 496 : i32
    %53 = tpu.dynamic_rotate %10 by %c496_i32_39 dim 1 : vector<8x512xf32>, i32 -> vector<8x512xf32>
    %c7 = arith.constant 7 : index
    %c0_40 = arith.constant 0 : index
    %c0_41 = arith.constant 0 : index
    %54 = vector.load %arg4[%c7, %c0_40, %c0_41] : memref<9x8x8xf32, #tpu.memory_space<vmem>>, vector<1x8x8xf32>
    %55 = vector.shape_cast %54 : vector<1x8x8xf32> to vector<8x8xf32>
    %cst_42 = arith.constant dense<0.000000e+00> : vector<8x512xf32>
    %56 = tpu.matmul %55, %53, %cst_42 {dimension_numbers = #tpu.dot_dimension_numbers<[1], [0], [0], [1], [0, 0, 1, 1], [], []>} : vector<8x8xf32>, vector<8x512xf32>, vector<8x512xf32> -> vector<8x512xf32>
    %57 = arith.addf %52, %56 : vector<8x512xf32>
    %c496_i32_43 = arith.constant 496 : i32
    %58 = tpu.dynamic_rotate %20 by %c496_i32_43 dim 1 : vector<8x512xf32>, i32 -> vector<8x512xf32>
    %c8 = arith.constant 8 : index
    %c0_44 = arith.constant 0 : index
    %c0_45 = arith.constant 0 : index
    %59 = vector.load %arg4[%c8, %c0_44, %c0_45] : memref<9x8x8xf32, #tpu.memory_space<vmem>>, vector<1x8x8xf32>
    %60 = vector.shape_cast %59 : vector<1x8x8xf32> to vector<8x8xf32>
    %cst_46 = arith.constant dense<0.000000e+00> : vector<8x512xf32>
    %61 = tpu.matmul %60, %58, %cst_46 {dimension_numbers = #tpu.dot_dimension_numbers<[1], [0], [0], [1], [0, 0, 1, 1], [], []>} : vector<8x8xf32>, vector<8x512xf32>, vector<8x512xf32> -> vector<8x512xf32>
    %62 = arith.addf %57, %61 : vector<8x512xf32>
    %63 = vector.broadcast %14 : vector<1x512xf32> to vector<8x512xf32>
    %64 = arith.mulf %63, %62 : vector<8x512xf32>
    %65 = arith.addf %48, %64 : vector<8x512xf32>
    %c0_47 = arith.constant 0 : index
    %c0_48 = arith.constant 0 : index
    %66 = vector.load %arg5[%c0_47, %c0_48] : memref<8x1xf32, #tpu.memory_space<vmem>>, vector<8x1xf32>
    %67 = vector.broadcast %66 : vector<8x1xf32> to vector<8x512xf32>
    %68 = arith.addf %65, %67 : vector<8x512xf32>
    %cst_49 = arith.constant 0.000000e+00 : f32
    %69 = vector.broadcast %cst_49 : f32 to vector<8x512xf32>
    %70 = arith.cmpf oge, %68, %69 : vector<8x512xf32>
    %cst_50 = arith.constant 1.000000e-01 : f32
    %71 = vector.broadcast %cst_50 : f32 to vector<8x512xf32>
    %72 = arith.mulf %71, %68 : vector<8x512xf32>
    %73 = arith.select %70, %68, %72 : vector<8x512xi1>, vector<8x512xf32>
    %74 = arith.addf %0, %73 : vector<8x512xf32>
    %c0_51 = arith.constant 0 : index
    %c0_52 = arith.constant 0 : index
    %75 = vector.load %arg7[%c0_51, %c0_52] : memref<8x512xf32, #tpu.memory_space<vmem>>, vector<8x512xf32>
    tpu.vector_store %arg7[%c0_51, %c0_52], %74 {strides = array<i32>} : memref<8x512xf32, #tpu.memory_space<vmem>>, vector<8x512xf32>,
    return
  }
  func.func @transform_0(%arg0: i32) -> (i32, i32) {
    %c0_i32 = arith.constant 0 : i32
    %c0_i32_0 = arith.constant 0 : i32
    return %c0_i32, %arg0 : i32, i32
  }
  func.func @transform_1(%arg0: i32) -> (i32, i32) {
    %c0_i32 = arith.constant 0 : i32
    %c0_i32_0 = arith.constant 0 : i32
    %c0_i32_1 = arith.constant 0 : i32
    return %c0_i32, %c0_i32_0 : i32, i32
  }
  func.func @transform_2(%arg0: i32) -> (i32, i32) {
    %c0_i32 = arith.constant 0 : i32
    %c0_i32_0 = arith.constant 0 : i32
    %c0_i32_1 = arith.constant 0 : i32
    return %c0_i32, %c0_i32_0 : i32, i32
  }
  func.func @transform_3(%arg0: i32) -> (i32, i32, i32) {
    %c0_i32 = arith.constant 0 : i32
    %c0_i32_0 = arith.constant 0 : i32
    %c0_i32_1 = arith.constant 0 : i32
    %c0_i32_2 = arith.constant 0 : i32
    return %c0_i32, %c0_i32_0, %c0_i32_1 : i32, i32, i32
  }
  func.func @transform_4(%arg0: i32) -> (i32, i32) {
    %c0_i32 = arith.constant 0 : i32
    %c0_i32_0 = arith.constant 0 : i32
    %c0_i32_1 = arith.constant 0 : i32
    return %c0_i32, %c0_i32_0 : i32, i32
  }
  func.func @transform_5(%arg0: i32) -> (i32, i32) {
    %c0_i32 = arith.constant 0 : i32
    %c0_i32_0 = arith.constant 0 : i32
    %c0_i32_1 = arith.constant 0 : i32
    return %c0_i32, %c0_i32_0 : i32, i32
  }
  func.func @transform_6(%arg0: i32) -> (i32, i32) {
    %c0_i32 = arith.constant 0 : i32
    %c0_i32_0 = arith.constant 0 : i32
    return %c0_i32, %arg0 : i32, i32
  }
}

</mosaic_0001>

<bundles_post_ra>
// kernel: tpu_custom_call.1
= control target key start
LH: loop header
LB: loop body
LE: loop exit
PB: predicated region body
PF: predicated region fallthrough
CT: control target
= control target key end

     0   :  { %vm35_vm0 = vcmask 64512   ;;  %s1551_s0 = inlined_call_operand.vmem [shape: f32[8,512], index: 0, kind: input, shape index: {}]   ;;  %s1552_s1 = inlined_call_operand.vmem [shape: f32[8,8], index: 1, kind: input, shape index: {}]   ;;  %s1553_s2 = inlined_call_operand.vmem [shape: f32[8,1], index: 2, kind: input, shape index: {}]   ;;  %s1554_s3 = inlined_call_operand.vmem [shape: f32[9,8,8], index: 3, kind: input, shape index: {}]   ;;  %s1555_s4 = inlined_call_operand.vmem [shape: f32[8,1], index: 4, kind: input, shape index: {}]   ;;  %s1556_s5 = inlined_call_operand.vmem [shape: f32[4,512], index: 5, kind: input, shape index: {}]   ;;  %s1557_s6 = inlined_call_operand.hbm [shape: f32[8,512], index: 6, kind: output, shape index: {}]  }
   0x1   :  { %v1306_v0 = vld [vmem:[%s1551_s0] sm:$0xff]  ;;  %v1311_v1 = vld [vmem:[%s1551_s0 + $0x8] sm:$0xff]  ;;  %v1316_v2 = vld [vmem:[%s1551_s0 + $0x10] sm:$0xff] }
   0x2   :  { %54 = vmatpush.msra.mxu0 %v1306_v0  ;;  %74 = vmatpush.msra.mxu1 %v1311_v1  ;;  %v1323_v3 = vld [vmem:[%s1551_s0 + $0x18] sm:$0xff]  ;;  %v28_v4 = vld [vmem:[%s1552_s1] sm:$0xff] }
   0x3   :  { %94 = vmatpush.msra.mxu2 %v1316_v2  ;;  %114 = vmatpush.msra.mxu3 %v1323_v3 }
   0x4   :  { %11 = vsyncpa [#allocation3], 0  ;;  %1122 = vmatmul.msk.f32.vlgmr.msra.gmra.mxu0 %vm35_vm0, %v28_v4  ;;  %1123 = vmatmul.msk.f32.vlgmr.msra.gmra.mxu1 %vm35_vm0, %v28_v4  ;;  %v29_v5 = vld [vmem:[%s1553_s2] sm:$0xff]  ;;  %v1262_v6 = vmov 0   ;;  %s1263_s0 = smov 1   ;;  %s1264_s1 = smov 127   ;;  %v146_v30 = vlaneseq }
   0x5   :  { %1124 = vmatmul.msk.f32.vlgmr.msra.gmra.mxu2 %vm35_vm0, %v28_v4  ;;  %1125 = vmatmul.msk.f32.vlgmr.msra.gmra.mxu3 %vm35_vm0, %v28_v4  ;;  %s1265_s2 = smov 16   ;;  %v1130_v28 = vld [vmem:[%s1554_s3 + $0x20] sm:$0xff]  ;;  %v1129_v44 = vld [vmem:[%s1554_s3 + $0x18] sm:$0xff]  ;;  %s1266_s17 = smov 112  }
   0x6   :  { %1179 = vset.pattern.permute.xlu0 %v1262_v6  ;;  %1235 = vset.pattern.permute.xlu1 %v1262_v6  ;;  %v131_v32 = vld [vmem:[%s1556_s5] ss:$4 sm:$0xf]  ;;  %v1377_v33 = vand.u32 127, %v146_v30  ;;  %s1113_s12 = sshll.u32 %s1557_s6, 4  ;;  %s1114_s12 = int_to_ptr.hbm [resolvable:$true] %s1113_s12 }
   0x7   :  { %32 = vperm.xlu0 %1179, %v29_v5   ;;  %v154_v34 = vperm.slane %v131_v32, 0  ;;  %v155_v35 = vperm.slane %v131_v32, 1  ;;  %v1126_v42 = vld [vmem:[%s1556_s5 + $0x1] ss:$4 sm:$0xf]  ;;  %v156_v45 = vperm.slane %v131_v32, 2 }
   0x8   :  { %vm148_vm5 = vcmp.lt.s32.totalorder %v1377_v33, 1  ;;  %vm174_vm6 = vcmp.lt.s32.totalorder %v1377_v33, 127  ;;  %v157_v46 = vperm.slane %v131_v32, 3  ;;  %v183_v47 = vperm.slane %v1126_v42, 3 }
   0x9   :  { %v180_v48 = vperm.slane %v1126_v42, 0  ;;  %v181_v61 = vperm.slane %v1126_v42, 1  ;;  %v182_v62 = vperm.slane %v1126_v42, 2  ;;  %vm459_vm7 = vcmp.lt.s32.totalorder %v1377_v33, 16  ;;  %v1076_v42 = vld [vmem:[%s1555_s4] sm:$0xff] }
   0xa   :  { %vm771_vm8 = vcmp.lt.s32.totalorder %v1377_v33, 112  ;;  %v1168_v33 = vld [vmem:[%s1554_s3 + $0x40] sm:$0xff] }
  0x79   :  { %v33_v7 = vpop.permute.xlu0 %32 }
  0x81   :  { %v56_v8 = vpop.f32.mrf.mxu0  ;;  %v76_v9 = vpop.f32.mrf.mxu1 }
  0x82   :  { %v57_v10 = vadd.f32 %v56_v8, %v33_v7  ;;  %v77_v11 = vadd.f32 %v76_v9, %v33_v7 }
  0x84   :  { %vm119_vm1 = vcmp.ge.f32.partialorder %v57_v10, 0.0  ;;  %v123_v12 = vmul.f32 0.1, %v57_v10  ;;  %vm120_vm2 = vcmp.ge.f32.partialorder %v77_v11, 0.0  ;;  %v124_v13 = vmul.f32 0.1, %v77_v11 }
  0x86   :  { %v1337_v14 = vsel %vm119_vm1, %v57_v10, %v123_v12  ;;  %v1339_v15 = vsel %vm120_vm2, %v77_v11, %v124_v13 }
  0x87   :  { %140 = vrot.lane.b32.xlu1 %v1339_v15, %s1263_s0  ;;  %234 = vmatpush.msrb.mxu1 %v1339_v15 }
  0x88   :  { %v96_v16 = vpop.f32.mrf.mxu2  ;;  %v116_v17 = vpop.f32.mrf.mxu3  ;;  %166 = vrot.lane.b32.xlu2 %v1337_v14, %s1264_s1  ;;  %138 = vrot.lane.b32.xlu0 %v1337_v14, %s1263_s0 }
  0x89   :  { %v97_v18 = vadd.f32 %v96_v16, %v33_v7  ;;  %v117_v19 = vadd.f32 %v116_v17, %v33_v7  ;;  %214 = vmatpush.msrb.mxu0 %v1337_v14  ;;  %1132 = vmatmul.msk.f32.vlgmr.msrb.gmra.mxu1 %vm35_vm0, %v1130_v28 }
  0x8a   :  { %1131 = vmatmul.msk.f32.vlgmr.msrb.gmra.mxu0 %vm35_vm0, %v1130_v28 }
  0x8b   :  { %vm121_vm3 = vcmp.ge.f32.partialorder %v97_v18, 0.0  ;;  %v125_v20 = vmul.f32 0.1, %v97_v18  ;;  %vm122_vm4 = vcmp.ge.f32.partialorder %v117_v19, 0.0  ;;  %v126_v21 = vmul.f32 0.1, %v117_v19 }
  0x8d   :  { %v1346_v22 = vsel %vm121_vm3, %v97_v18, %v125_v20  ;;  %v1348_v23 = vsel %vm122_vm4, %v117_v19, %v126_v21 }
  0x8e   :  { %254 = vmatpush.msrb.mxu2 %v1346_v22  ;;  %274 = vmatpush.msrb.mxu3 %v1348_v23  ;;  %v1210_v24 = vpack.i.bf16 %v1346_v22, %v1337_v14  ;;  %v1215_v25 = vpack.i.bf16 %v1339_v15, %v1348_v23  ;;  %v1180_v26 = vpack.i.bf16 %v1346_v22, %v1339_v15 }
  0x8f   :  { %142 = vrot.lane.b32.xlu1 %v1346_v22, %s1263_s0  ;;  %v1185_v27 = vpack.i.bf16 %v1337_v14, %v1348_v23  ;;  %1133 = vmatmul.msk.f32.vlgmr.msrb.gmra.mxu2 %vm35_vm0, %v1130_v28 }
  0x90   :  { %144 = vrot.lane.b32.xlu2 %v1348_v23, %s1263_s0  ;;  %168 = vrot.lane.b32.xlu0 %v1339_v15, %s1264_s1  ;;  %v1144_v15 = vld [vmem:[%s1554_s3 + $0x8] sm:$0xff] }
  0x91   :  { %1134 = vmatmul.msk.f32.vlgmr.msrb.gmra.mxu3 %vm35_vm0, %v1130_v28  ;;  %v464_v28 = vld [vmem:[%s1554_s3] sm:$0xff] }
  0x97   :  { %170 = vrot.lane.b32.xlu1 %v1346_v22, %s1264_s1 }
  0x98   :  { %172 = vrot.lane.b32.xlu2 %v1348_v23, %s1264_s1  ;;  %1181 = vrot.lane.b32.xlu0 %v1180_v26, %s1265_s2  ;;  %v1139_v26 = vld [vmem:[%s1554_s3 + $0x28] sm:$0xff] }
  0x9f   :  { %1186 = vrot.lane.b32.xlu1 %v1185_v27, %s1265_s2 }
  0xe2   :  { %v167_v29 = vpop.permute.xlu2 %166 }
  0xea   :  { %v145_v31 = vpop.permute.xlu2 %144 }
  0xf2   :  { %v173_v43 = vpop.permute.xlu2 %172 }
  0xf3   :  { %v178_v49 = vsel %vm174_vm6, %v173_v43, %v167_v29 }
  0xf4   :  { %v191_v57 = vmul.f32 %v183_v47, %v178_v49 }
  0xf9   :  { %v141_v36 = vpop.permute.xlu1 %140 }
  0xfa   :  { %v139_v37 = vpop.permute.xlu0 %138 }
  0xfb   :  { %v151_v38 = vsel %vm148_vm5, %v139_v37, %v141_v36  ;;  %v152_v39 = vsel %vm148_vm5, %v145_v31, %v139_v37 }
  0xfc   :  { %v1384_v40 = vmul.f32 %v154_v34, %v152_v39  ;;  %v1386_v41 = vmul.f32 %v155_v35, %v151_v38 }
  0xfe   :  { %297 = vmatpush.msra.mxu0 %v1384_v40  ;;  %317 = vmatpush.msra.mxu1 %v1386_v41 }
  0xff   :  { %1135 = vmatmul.msk.f32.vlgmr.msra.gmra.mxu0 %vm35_vm0, %v1129_v44  ;;  %1136 = vmatmul.msk.f32.vlgmr.msra.gmra.mxu1 %vm35_vm0, %v1129_v44 }
 0x101   :  { %v143_v50 = vpop.permute.xlu1 %142 }
 0x102   :  { %v149_v51 = vsel %vm148_vm5, %v143_v50, %v145_v31  ;;  %v150_v52 = vsel %vm148_vm5, %v141_v36, %v143_v50  ;;  %v169_v53 = vpop.permute.xlu0 %168 }
 0x103   :  { %v164_v54 = vmul.f32 %v156_v45, %v150_v52  ;;  %v165_v55 = vmul.f32 %v157_v46, %v149_v51  ;;  %v177_v56 = vsel %vm174_vm6, %v167_v29, %v169_v53  ;;  %v1153_v46 = vld [vmem:[%s1554_s3 + $0x10] sm:$0xff] }
 0x104   :  { %v188_v58 = vmul.f32 %v180_v48, %v177_v56 }
 0x105   :  { %337 = vmatpush.msra.mxu2 %v164_v54  ;;  %357 = vmatpush.msra.mxu3 %v165_v55  ;;  %v1195_v59 = vpack.i.bf16 %v1384_v40, %v165_v55  ;;  %v1190_v60 = vpack.i.bf16 %v164_v54, %v1386_v41  ;;  %v1225_v14 = vpack.i.bf16 %v1386_v41, %v165_v55 }
 0x106   :  { %382 = vmatpush.msrb.mxu0 %v188_v58  ;;  %1137 = vmatmul.msk.f32.vlgmr.msra.gmra.mxu2 %vm35_vm0, %v1129_v44  ;;  %v1205_v12 = vpack.i.bf16 %v188_v58, %v191_v57  ;;  %v1220_v22 = vpack.i.bf16 %v164_v54, %v1384_v40 }
 0x107   :  { %442 = vmatpush.msrb.mxu3 %v191_v57  ;;  %1196 = vrot.lane.b32.xlu0 %v1195_v59, %s1265_s2 }
 0x108   :  { %1191 = vrot.lane.b32.xlu2 %v1190_v60, %s1265_s2  ;;  %1138 = vmatmul.msk.f32.vlgmr.msra.gmra.mxu3 %vm35_vm0, %v1129_v44 }
 0x109   :  { %v171_v63 = vpop.permute.xlu1 %170  ;;  %1140 = vmatmul.msk.f32.vlgmr.msrb.gmra.mxu0 %vm35_vm0, %v1139_v26 }
 0x10a   :  { %v175_v4 = vsel %vm174_vm6, %v171_v63, %v173_v43  ;;  %v176_v5 = vsel %vm174_vm6, %v169_v53, %v171_v63  ;;  %v1182_v6 = vpop.permute.xlu0 %1181 }
 0x10b   :  { %v189_v7 = vmul.f32 %v181_v61, %v176_v5  ;;  %v190_v8 = vmul.f32 %v182_v62, %v175_v4  ;;  %v1184_v9 = vunpack.i.h.bf16 %v1182_v6  ;;  %v1183_v10 = vunpack.i.l.bf16 %v1182_v6  ;;  %v1159_v5 = vld [vmem:[%s1554_s3 + $0x38] sm:$0xff] }
 0x10d   :  { %402 = vmatpush.msrb.mxu1 %v189_v7  ;;  %422 = vmatpush.msrb.mxu2 %v190_v8  ;;  %v474_v11 = vsel %vm459_vm7, %v1183_v10, %v1184_v9  ;;  %v1200_v13 = vpack.i.bf16 %v190_v8, %v189_v7 }
 0x10e   :  { %1142 = vmatmul.msk.f32.vlgmr.msrb.gmra.mxu2 %vm35_vm0, %v1139_v26  ;;  %1141 = vmatmul.msk.f32.vlgmr.msrb.gmra.mxu1 %vm35_vm0, %v1139_v26 }
 0x10f   :  { %537 = vmatpush.msra.mxu2 %v474_v11  ;;  %1211 = vrot.lane.b32.xlu0 %v1210_v24, %s1266_s17  ;;  %v1230_v24 = vpack.i.bf16 %v190_v8, %v188_v58 }
 0x110   :  { %1206 = vrot.lane.b32.xlu2 %v1205_v12, %s1265_s2  ;;  %1201 = vrot.lane.b32.xlu1 %v1200_v13, %s1265_s2 }
 0x111   :  { %v1187_v16 = vpop.permute.xlu1 %1186  ;;  %1143 = vmatmul.msk.f32.vlgmr.msrb.gmra.mxu3 %vm35_vm0, %v1139_v26 }
 0x112   :  { %v1189_v17 = vunpack.i.h.bf16 %v1187_v16  ;;  %v1188_v18 = vunpack.i.l.bf16 %v1187_v16  ;;  %v256_v26 = vpop.f32.mrf.mxu2 }
 0x114   :  { %v476_v19 = vsel %vm459_vm7, %v1188_v18, %v1189_v17  ;;  %v475_v20 = vsel %vm459_vm7, %v1189_v17, %v1183_v10  ;;  %v473_v21 = vsel %vm459_vm7, %v1184_v9, %v1188_v18 }
 0x115   :  { %497 = vmatpush.msra.mxu0 %v476_v19  ;;  %517 = vmatpush.msra.mxu1 %v475_v20 }
 0x116   :  { %557 = vmatpush.msra.mxu3 %v473_v21  ;;  %1147 = vmatmul.msk.f32.vlgmr.msra.gmra.mxu2 %vm35_vm0, %v1144_v15  ;;  %v1158_v21 = vld [vmem:[%s1554_s3 + $0x30] sm:$0xff] }
 0x117   :  { %1226 = vrot.lane.b32.xlu0 %v1225_v14, %s1266_s17  ;;  %1145 = vmatmul.msk.f32.vlgmr.msra.gmra.mxu0 %vm35_vm0, %v1144_v15  ;;  %v216_v14 = vpop.f32.mrf.mxu0 }
 0x118   :  { %1221 = vrot.lane.b32.xlu2 %v1220_v22, %s1266_s17  ;;  %1216 = vrot.lane.b32.xlu1 %v1215_v25, %s1266_s17  ;;  %v236_v22 = vpop.f32.mrf.mxu1 }
 0x119   :  { %1146 = vmatmul.msk.f32.vlgmr.msra.gmra.mxu1 %vm35_vm0, %v1144_v15  ;;  %1148 = vmatmul.msk.f32.vlgmr.msra.gmra.mxu3 %vm35_vm0, %v1144_v15 }
 0x11f   :  { %960 = vrot.lane.b32.xlu0 %v189_v7, %s1266_s17 }
 0x120   :  { %964 = vrot.lane.b32.xlu2 %v191_v57, %s1266_s17  ;;  %1231 = vrot.lane.b32.xlu1 %v1230_v24, %s1266_s17  ;;  %v1529_v24 = vpop.f32.mrf.mxu3 }
 0x128   :  { %1079 = vperm.xlu1 %1235, %v1076_v42  }
 0x162   :  { %v1192_v23 = vpop.permute.xlu2 %1191 }
 0x163   :  { %v1194_v25 = vunpack.i.h.bf16 %v1192_v23  ;;  %v1193_v27 = vunpack.i.l.bf16 %v1192_v23 }
 0x165   :  { %v461_v29 = vsel %vm459_vm7, %v1193_v27, %v1194_v25 }
 0x166   :  { %620 = vmatpush.msrb.mxu2 %v461_v29 }
 0x167   :  { %1151 = vmatmul.msk.f32.vlgmr.msrb.gmra.mxu2 %vm35_vm0, %v464_v28 }
 0x16a   :  { %v1207_v30 = vpop.permute.xlu2 %1206 }
 0x16b   :  { %v1209_v35 = vunpack.i.h.bf16 %v1207_v30  ;;  %v1208_v36 = vunpack.i.l.bf16 %v1207_v30 }
 0x16d   :  { %v656_v40 = vsel %vm459_vm7, %v1208_v36, %v1209_v35 }
 0x172   :  { %v1222_v50 = vpop.permute.xlu2 %1221 }
 0x173   :  { %v1224_v58 = vunpack.i.h.bf16 %v1222_v50  ;;  %v1223_v59 = vunpack.i.l.bf16 %v1222_v50 }
 0x179   :  { %v1197_v31 = vpop.permute.xlu0 %1196 }
 0x17a   :  { %v1199_v32 = vunpack.i.h.bf16 %v1197_v31  ;;  %v1198_v34 = vunpack.i.l.bf16 %v1197_v31  ;;  %v965_v13 = vpop.permute.xlu2 %964 }
 0x17c   :  { %v463_v37 = vsel %vm459_vm7, %v1198_v34, %v1199_v32  ;;  %v462_v38 = vsel %vm459_vm7, %v1199_v32, %v1193_v27  ;;  %v460_v39 = vsel %vm459_vm7, %v1194_v25, %v1198_v34  ;;  %v299_v15 = vpop.f32.mrf.mxu0  ;;  %v319_v23 = vpop.f32.mrf.mxu1 }
 0x17d   :  { %580 = vmatpush.msrb.mxu0 %v463_v37  ;;  %600 = vmatpush.msrb.mxu1 %v462_v38 }
 0x17e   :  { %640 = vmatpush.msrb.mxu3 %v460_v39  ;;  %1149 = vmatmul.msk.f32.vlgmr.msrb.gmra.mxu0 %vm35_vm0, %v464_v28 }
 0x17f   :  { %1150 = vmatmul.msk.f32.vlgmr.msrb.gmra.mxu1 %vm35_vm0, %v464_v28  ;;  %1152 = vmatmul.msk.f32.vlgmr.msrb.gmra.mxu3 %vm35_vm0, %v464_v28 }
 0x180   :  { %677 = vmatpush.msra.mxu0 %v656_v40 }
 0x181   :  { %v1212_v41 = vpop.permute.xlu0 %1211 }
 0x182   :  { %v1202_v43 = vpop.permute.xlu1 %1201  ;;  %v1214_v52 = vunpack.i.h.bf16 %v1212_v41  ;;  %v1213_v54 = vunpack.i.l.bf16 %v1212_v41 }
 0x183   :  { %v1204_v44 = vunpack.i.h.bf16 %v1202_v43  ;;  %v1203_v45 = vunpack.i.l.bf16 %v1202_v43 }
 0x185   :  { %v655_v47 = vsel %vm459_vm7, %v1209_v35, %v1203_v45  ;;  %v654_v48 = vsel %vm459_vm7, %v1203_v45, %v1204_v44  ;;  %v653_v49 = vsel %vm459_vm7, %v1204_v44, %v1208_v36 }
 0x186   :  { %697 = vmatpush.msra.mxu1 %v655_v47  ;;  %717 = vmatpush.msra.mxu2 %v654_v48  ;;  %v384_v28 = vpop.f32.mrf.mxu0 }
 0x187   :  { %737 = vmatpush.msra.mxu3 %v653_v49  ;;  %1154 = vmatmul.msk.f32.vlgmr.msra.gmra.mxu0 %vm35_vm0, %v1153_v46  ;;  %v1127_v49 = vld [vmem:[%s1556_s5 + $0x2] ss:$4 sm:$0xf] }
 0x188   :  { %1155 = vmatmul.msk.f32.vlgmr.msra.gmra.mxu1 %vm35_vm0, %v1153_v46  ;;  %1156 = vmatmul.msk.f32.vlgmr.msra.gmra.mxu2 %vm35_vm0, %v1153_v46 }
 0x189   :  { %1157 = vmatmul.msk.f32.vlgmr.msra.gmra.mxu3 %vm35_vm0, %v1153_v46  ;;  %v1227_v51 = vpop.permute.xlu0 %1226  ;;  %v339_v27 = vpop.f32.mrf.mxu2 }
 0x18a   :  { %v1217_v53 = vpop.permute.xlu1 %1216  ;;  %v1229_v57 = vunpack.i.h.bf16 %v1227_v51  ;;  %v1228_v60 = vunpack.i.l.bf16 %v1227_v51 }
 0x18b   :  { %v1219_v55 = vunpack.i.h.bf16 %v1217_v53  ;;  %v1218_v56 = vunpack.i.l.bf16 %v1217_v53  ;;  %v359_v25 = vpop.f32.mrf.mxu3  ;;  %v404_v29 = vpop.f32.mrf.mxu1 }
 0x18c   :  { %v774_v6 = vsel %vm771_vm8, %v1223_v59, %v1229_v57  ;;  %v773_v7 = vsel %vm771_vm8, %v1229_v57, %v1224_v58  ;;  %v772_v8 = vsel %vm771_vm8, %v1224_v58, %v1228_v60  ;;  %v775_v9 = vsel %vm771_vm8, %v1228_v60, %v1223_v59  ;;  %v1128_v58 = vld [vmem:[%s1556_s5 + $0x3] ss:$4 sm:$0xf]  ;;  %s1267_s5 = smov [#allocation2]  }
 0x18d   :  { %v788_v61 = vsel %vm771_vm8, %v1213_v54, %v1219_v55  ;;  %v787_v62 = vsel %vm771_vm8, %v1219_v55, %v1214_v52  ;;  %v786_v63 = vsel %vm771_vm8, %v1214_v52, %v1218_v56  ;;  %v789_v4 = vsel %vm771_vm8, %v1218_v56, %v1213_v54  ;;  %s1111_s9 = sshll.u32 %s1267_s5, 4  ;;  %s1112_s9 = int_to_ptr.vmem [resolvable:$true] %s1111_s9 }
 0x18e   :  { %810 = vmatpush.msrb.mxu0 %v788_v61  ;;  %830 = vmatpush.msrb.mxu1 %v787_v62  ;;  %v747_v55 = vperm.slane %v1127_v49, 0  ;;  %v748_v57 = vperm.slane %v1127_v49, 1  ;;  %v300_v59 = vadd.f32 %v299_v15, %v216_v14  ;;  %v320_v60 = vadd.f32 %v319_v23, %v236_v22 }
 0x18f   :  { %850 = vmatpush.msrb.mxu2 %v786_v63  ;;  %870 = vmatpush.msrb.mxu3 %v789_v4  ;;  %v1060_v61 = vperm.slane %v1128_v58, 0  ;;  %v1061_v62 = vperm.slane %v1128_v58, 1 }
 0x190   :  { %1160 = vmatmul.msk.f32.vlgmr.msrb.gmra.mxu0 %vm35_vm0, %v1159_v5  ;;  %1161 = vmatmul.msk.f32.vlgmr.msrb.gmra.mxu1 %vm35_vm0, %v1159_v5 }
 0x191   :  { %1162 = vmatmul.msk.f32.vlgmr.msrb.gmra.mxu2 %vm35_vm0, %v1159_v5  ;;  %1163 = vmatmul.msk.f32.vlgmr.msrb.gmra.mxu3 %vm35_vm0, %v1159_v5  ;;  %v961_v16 = vpop.permute.xlu0 %960  ;;  %v1533_v31 = vpop.f32.mrf.mxu2 }
 0x192   :  { %893 = vmatpush.msra.mxu0 %v774_v6  ;;  %913 = vmatpush.msra.mxu1 %v773_v7  ;;  %v1232_v10 = vpop.permute.xlu1 %1231 }
 0x193   :  { %933 = vmatpush.msra.mxu2 %v772_v8  ;;  %953 = vmatpush.msra.mxu3 %v775_v9  ;;  %v1234_v11 = vunpack.i.h.bf16 %v1232_v10  ;;  %v1233_v12 = vunpack.i.l.bf16 %v1232_v10 }
 0x194   :  { %v1531_v30 = vpop.f32.mrf.mxu3  ;;  %v499_v32 = vpop.f32.mrf.mxu0 }
 0x195   :  { %v967_v17 = vsel %vm771_vm8, %v961_v16, %v1234_v11  ;;  %v968_v18 = vsel %vm771_vm8, %v1233_v12, %v961_v16  ;;  %v966_v19 = vsel %vm771_vm8, %v1234_v11, %v965_v13  ;;  %v969_v20 = vsel %vm771_vm8, %v965_v13, %v1233_v12 }
 0x196   :  { %990 = vmatpush.msrb.mxu0 %v968_v18  ;;  %1010 = vmatpush.msrb.mxu1 %v967_v17  ;;  %v519_v34 = vpop.f32.mrf.mxu1  ;;  %v447_v13 = vadd.f32 %v384_v28, %v300_v59  ;;  %v448_v16 = vadd.f32 %v404_v29, %v320_v60 }
 0x197   :  { %1030 = vmatpush.msrb.mxu2 %v966_v19  ;;  %1050 = vmatpush.msrb.mxu3 %v969_v20  ;;  %v749_v20 = vperm.slane %v1127_v49, 2 }
 0x198   :  { %1164 = vmatmul.msk.f32.vlgmr.msra.gmra.mxu0 %vm35_vm0, %v1158_v21  ;;  %1165 = vmatmul.msk.f32.vlgmr.msra.gmra.mxu1 %vm35_vm0, %v1158_v21 }
 0x199   :  { %1166 = vmatmul.msk.f32.vlgmr.msra.gmra.mxu2 %vm35_vm0, %v1158_v21  ;;  %1167 = vmatmul.msk.f32.vlgmr.msra.gmra.mxu3 %vm35_vm0, %v1158_v21  ;;  %v539_v36 = vpop.f32.mrf.mxu2 }
 0x19c   :  { %v559_v35 = vpop.f32.mrf.mxu3 }
 0x1a0   :  { %1169 = vmatmul.msk.f32.vlgmr.msrb.gmra.mxu0 %vm35_vm0, %v1168_v33  ;;  %1170 = vmatmul.msk.f32.vlgmr.msrb.gmra.mxu1 %vm35_vm0, %v1168_v33 }
 0x1a1   :  { %1171 = vmatmul.msk.f32.vlgmr.msrb.gmra.mxu2 %vm35_vm0, %v1168_v33  ;;  %1172 = vmatmul.msk.f32.vlgmr.msrb.gmra.mxu3 %vm35_vm0, %v1168_v33  ;;  %v750_v33 = vperm.slane %v1127_v49, 3 }
 0x1ea   :  { %v622_v40 = vpop.f32.mrf.mxu2 }
 0x1eb   :  { %v623_v9 = vadd.f32 %v622_v40, %v539_v36 }
 0x1fb   :  { %v582_v37 = vpop.f32.mrf.mxu0 }
 0x1fc   :  { %v602_v38 = vpop.f32.mrf.mxu1  ;;  %v583_v52 = vadd.f32 %v582_v37, %v499_v32  ;;  %v340_v32 = vadd.f32 %v339_v27, %v256_v26  ;;  %v1080_v37 = vpop.permute.xlu1 %1079 }
 0x1fd   :  { %v603_v53 = vadd.f32 %v602_v38, %v519_v34  ;;  %v360_v34 = vadd.f32 %v359_v25, %v1529_v24  ;;  %v1062_v38 = vperm.slane %v1128_v58, 2 }
 0x1ff   :  { %v450_v49 = vadd.f32 %v1531_v30, %v360_v34 }
 0x202   :  { %v642_v39 = vpop.f32.mrf.mxu3 }
 0x203   :  { %v643_v10 = vadd.f32 %v642_v39, %v559_v35  ;;  %v1063_v39 = vperm.slane %v1128_v58, 3 }
 0x204   :  { %v679_v41 = vpop.f32.mrf.mxu0 }
 0x205   :  { %v699_v42 = vpop.f32.mrf.mxu1  ;;  %v742_v54 = vadd.f32 %v679_v41, %v583_v52 }
 0x206   :  { %v743_v56 = vadd.f32 %v699_v42, %v603_v53 }
 0x207   :  { %v755_v63 = vmul.f32 %v747_v55, %v742_v54 }
 0x208   :  { %v756_v4 = vmul.f32 %v748_v57, %v743_v56 }
 0x209   :  { %v759_v14 = vadd.f32 %v755_v63, %v447_v13 }
 0x20a   :  { %v760_v22 = vadd.f32 %v756_v4, %v448_v16 }
 0x20b   :  { %v719_v43 = vpop.f32.mrf.mxu2 }
 0x20c   :  { %v739_v44 = vpop.f32.mrf.mxu3  ;;  %v744_v19 = vadd.f32 %v719_v43, %v623_v9 }
 0x20d   :  { %v812_v45 = vpop.f32.mrf.mxu0  ;;  %v832_v46 = vpop.f32.mrf.mxu1  ;;  %v745_v21 = vadd.f32 %v739_v44, %v643_v10 }
 0x20e   :  { %v757_v28 = vmul.f32 %v749_v20, %v744_v19 }
 0x20f   :  { %v758_v29 = vmul.f32 %v750_v33, %v745_v21 }
 0x214   :  { %v852_v47 = vpop.f32.mrf.mxu2  ;;  %v872_v48 = vpop.f32.mrf.mxu3 }
 0x215   :  { %v895_v50 = vpop.f32.mrf.mxu0  ;;  %v915_v51 = vpop.f32.mrf.mxu1 }
 0x216   :  { %v896_v5 = vadd.f32 %v895_v50, %v812_v45  ;;  %v916_v6 = vadd.f32 %v915_v51, %v832_v46  ;;  %v449_v46 = vadd.f32 %v1533_v31, %v340_v32  ;;  %v762_v51 = vadd.f32 %v758_v29, %v450_v49 }
 0x218   :  { %v761_v50 = vadd.f32 %v757_v28, %v449_v46 }
 0x21c   :  { %v935_v7 = vpop.f32.mrf.mxu2  ;;  %v955_v8 = vpop.f32.mrf.mxu3 }
 0x21d   :  { %v992_v11 = vpop.f32.mrf.mxu0  ;;  %v1012_v12 = vpop.f32.mrf.mxu1  ;;  %v936_v40 = vadd.f32 %v935_v7, %v852_v47  ;;  %v956_v41 = vadd.f32 %v955_v8, %v872_v48 }
 0x21e   :  { %v1055_v17 = vadd.f32 %v992_v11, %v896_v5  ;;  %v1056_v18 = vadd.f32 %v1012_v12, %v916_v6 }
 0x220   :  { %v1068_v15 = vmul.f32 %v1060_v61, %v1055_v17  ;;  %v1069_v23 = vmul.f32 %v1061_v62, %v1056_v18 }
 0x222   :  { %v1072_v36 = vadd.f32 %v1068_v15, %v759_v14  ;;  %v1073_v35 = vadd.f32 %v1069_v23, %v760_v22 }
 0x224   :  { %v1082_v42 = vadd.f32 %v1080_v37, %v1072_v36  ;;  %v1083_v43 = vadd.f32 %v1080_v37, %v1073_v35  ;;  %v1032_v44 = vpop.f32.mrf.mxu2  ;;  %v1052_v45 = vpop.f32.mrf.mxu3 }
 0x225   :  { %v1057_v26 = vadd.f32 %v1032_v44, %v936_v40  ;;  %v1058_v27 = vadd.f32 %v1052_v45, %v956_v41 }
 0x226   :  { %vm1086_vm9 = vcmp.ge.f32.partialorder %v1082_v42, 0.0  ;;  %vm1087_vm10 = vcmp.ge.f32.partialorder %v1083_v43, 0.0  ;;  %v1090_v24 = vmul.f32 0.1, %v1082_v42  ;;  %v1091_v25 = vmul.f32 0.1, %v1083_v43 }
 0x227   :  { %v1070_v52 = vmul.f32 %v1062_v38, %v1057_v26  ;;  %v1071_v53 = vmul.f32 %v1063_v39, %v1058_v27 }
 0x228   :  { %v1094_v47 = vsel %vm1086_vm9, %v1082_v42, %v1090_v24  ;;  %v1095_v48 = vsel %vm1087_vm10, %v1083_v43, %v1091_v25 }
 0x229   :  { %v1098_v54 = vadd.f32 %v1094_v47, %v1306_v0  ;;  %v1099_v55 = vadd.f32 %v1095_v48, %v1311_v1  ;;  %v1074_v56 = vadd.f32 %v1070_v52, %v761_v50  ;;  %v1075_v31 = vadd.f32 %v1071_v53, %v762_v51 }
 0x22b   :  { %1102 = vst [vmem:[#allocation2] sm:$0xff] %v1098_v54  ;;  %v1084_v30 = vadd.f32 %v1080_v37, %v1074_v56  ;;  %v1085_v57 = vadd.f32 %v1080_v37, %v1075_v31 }
 0x22c   :  { %1103 = vst [vmem:[#allocation2 + $0x8] sm:$0xff] %v1099_v55 }
 0x22d   :  { %vm1088_vm11 = vcmp.ge.f32.partialorder %v1084_v30, 0.0  ;;  %v1092_v58 = vmul.f32 0.1, %v1084_v30  ;;  %vm1089_vm12 = vcmp.ge.f32.partialorder %v1085_v57, 0.0  ;;  %v1093_v59 = vmul.f32 0.1, %v1085_v57 }
 0x22f   :  { %v1096_v60 = vsel %vm1088_vm11, %v1084_v30, %v1092_v58  ;;  %v1097_v0 = vsel %vm1089_vm12, %v1085_v57, %v1093_v59 }
 0x230   :  { %v1100_v1 = vadd.f32 %v1096_v60, %v1316_v2  ;;  %v1101_v61 = vadd.f32 %v1097_v0, %v1323_v3 }
 0x232   :  { %1104 = vst [vmem:[#allocation2 + $0x10] sm:$0xff] %v1100_v1 }
 0x233   :  { %1105 = vst [vmem:[#allocation2 + $0x18] sm:$0xff] %v1101_v61 }
 0x234   :  { %1116 = dma.vmem_to_hbm [thread:$0]  %s1112_s9, 512, %s1114_s12, [#allocation3]  }
 0x235   :  { %1260 = dma.done.wait [#allocation3], 512  }
 0x236   :  { %1261 = vsyncadd [#allocation3], 4294966784 }
 0x237   :  { %1121 = vsyncpa [#allocation3], 1 }

</bundles_post_ra>
